<compile_context>
chip_gen: v6e
topology: v6e:2x2x1
jax: 0.10.0
libtpu: 0.0.40
codegen_flags: <defaults>
</compile_context>

<pallas_src>
import jax
import jax.numpy as jnp
from jax.experimental import pallas as pl
from jax.experimental.pallas import tpu as pltpu

_LANE = 128      # lane width of a vreg
_SUBLANE = 8     # sublane count of a vreg


def _round_up(x: int, m: int) -> int:
    return ((x + m - 1) // m) * m


def _nchl_fused_kernel(x_ref, *refs):
    """Fused chain: h = tanh(h @ W_l) for every pre-transposed, lane-padded weight.

    x_ref : (TB, Fin_pad)  f32 batch tile (lane-dense)
    refs  : (W_0, ..., W_{L-1}, out); W_l are (Fin_pad_l, Fout_pad_l) bf16,
            whole-array resident in VMEM.  out is (TB, Fout_pad) f32.
    """
    w_refs, o_ref = refs[:-1], refs[-1]
    h = x_ref[...].astype(jnp.bfloat16)          # bf16 MXU operand
    n_layers = len(w_refs)
    for idx, w_ref in enumerate(w_refs):
        acc = jnp.dot(h, w_ref[...], preferred_element_type=jnp.float32)
        a = jnp.tanh(acc)                        # f32 tanh on the EUP
        # TODO(synk): a bf16 tanh on v6e/v7x would double EUP throughput for
        # this EUP-bound chain; kept f32 so the same kernel is safe on v5e.
        h = a if idx == n_layers - 1 else a.astype(jnp.bfloat16)
    o_ref[...] = h                               # lane-dense f32 store


def build_nchl_params(weights, weight_dtype=jnp.bfloat16):
    """One-time model prep (hoisted out of the per-call hot path).

    - transpose from nn.Linear layout (Fout, Fin) to (Fin, Fout)
    - zero-pad every Fin/Fout up to a multiple of 128 lanes (lane-dense layouts)
    - cast to bf16 (MXU-native; halves weight DMA and resident VMEM)
    """
    fin_first = int(weights[0].shape[1])
    fout_last = int(weights[-1].shape[0])
    wts = []
    for w in weights:
        wt = jnp.asarray(w, dtype=jnp.float32).T              # (Fin, Fout)
        fi, fo = wt.shape
        wt = jnp.pad(wt, ((0, _round_up(fi, _LANE) - fi),
                          (0, _round_up(fo, _LANE) - fo)))
        wts.append(wt.astype(weight_dtype))
    return wts, fin_first, fout_last


def nchl_forward(x: jax.Array, model, *, tb: int | None = None) -> jax.Array:
    """NCHL.forward: fused chain of tanh(Linear) layers in one pallas_call."""
    wts, fin, fout_last = model
    if x.ndim == 1:
        x = x[None, :]
    x = x.astype(jnp.float32)
    B, fin_x = x.shape
    assert fin_x == fin, (fin_x, fin)

    fin_pad = wts[0].shape[0]
    fout_pad = wts[-1].shape[1]

    # Batch tile: sublane-aligned and sized from the actual batch.  For batches
    # larger than one sublane, use >= 2 tiles so both v7x TensorCores get work;
    # cap at 512 rows/tile to bound per-tile VMEM / amortize per-step overhead.
    if tb is None:
        b_aligned = _round_up(B, _SUBLANE)
        if b_aligned <= _SUBLANE:
            tb = _SUBLANE
        else:
            tb = min(512, _round_up(pl.cdiv(b_aligned, 2), _SUBLANE))
    b_pad = _round_up(B, tb)

    # Zero-pad batch (sublane) and input-feature (lane) dims once; inert.
    x = jnp.pad(x, ((0, b_pad - B), (0, fin_pad - fin)))

    grid = (b_pad // tb,)
    in_specs = [pl.BlockSpec((tb, fin_pad), lambda i: (i, 0))]
    for _ in wts:
        # Whole-array, single-resident VMEM operand: copied in once, no
        # per-step DMA, no double buffering (Buffered(1) intent).
        in_specs.append(pl.BlockSpec(memory_space=pltpu.MemorySpace.VMEM))

    # Explicit VMEM budget: double-buffered x/out tiles (f32) + the
    # single-resident bf16 weights, with 2x headroom, clamped to sane bounds.
    weight_bytes = sum(int(w.size) * w.dtype.itemsize for w in wts)
    tile_bytes = 2 * tb * (fin_pad + fout_pad) * 4
    vmem_limit = int(min(128 << 20, max(16 << 20, 2 * (weight_bytes + tile_bytes))))

    out = pl.pallas_call(
        _nchl_fused_kernel,
        out_shape=jax.ShapeDtypeStruct((b_pad, fout_pad), jnp.float32),
        grid=grid,
        in_specs=in_specs,
        out_specs=pl.BlockSpec((tb, fout_pad), lambda i: (i, 0)),
        compiler_params=pltpu.CompilerParams(
            dimension_semantics=("parallel",),   # shard batch tiles across TCs (v7x)
            vmem_limit_bytes=vmem_limit,
        ),
    )(x, *wts)

    # Strip batch / lane padding.
    return out[:B, :fout_last]


def xavier_uniform(key, fan_out: int, fan_in: int, gain: float = 0.5) -> jax.Array:
    """Matches torch.nn.init.xavier_uniform_(weight, gain) for a (out, in) matrix."""
    bound = gain * jnp.sqrt(6.0 / (fan_in + fan_out))
    return jax.random.uniform(
        key, (fan_out, fan_in), dtype=jnp.float32, minval=-bound, maxval=bound
    )


# TODO(synk): Neuron activation / weight-change bookkeeping (Python-list side
# effects in NCHL.forward / update_weights) has no Pallas equivalent and does
# not affect the returned tensor, so it is intentionally omitted.

if __name__ == "__main__":
    # NCHL(nodes=[8, 32, 4]) -> two bias-free Linear layers: 8->32, 32->4
    nodes = [8, 32, 4]
    batch = 2

    key = jax.random.PRNGKey(0)
    k_x, *k_ws = jax.random.split(key, 1 + (len(nodes) - 1))

    # Deterministic xavier-uniform(gain=0.5) init, PyTorch Linear layout (out, in).
    weights = [
        xavier_uniform(k_ws[i], nodes[i + 1], nodes[i], gain=0.5)
        for i in range(len(nodes) - 1)
    ]

    # One-time prep: transpose, lane-pad all dims, cast weights to bf16.
    model = build_nchl_params(weights)

    x = jax.random.normal(k_x, (batch, nodes[0]), dtype=jnp.float32)

    out = jax.block_until_ready(nchl_forward(x, model))
    assert out.shape == (batch, nodes[-1]), out.shape

    # Pure-JAX f32 reference (original PyTorch math).
    ref_f32 = x
    for w in weights:
        ref_f32 = jnp.tanh(ref_f32 @ w.T)

    # Reference emulating the kernel's bf16-operand / f32-accumulate precision.
    ref_bf = x
    for w in weights:
        ref_bf = jnp.tanh(
            ref_bf.astype(jnp.bfloat16).astype(jnp.float32)
            @ w.astype(jnp.bfloat16).astype(jnp.float32).T
        )

    assert jnp.allclose(out, ref_bf, atol=1e-3, rtol=1e-3), float(
        jnp.max(jnp.abs(out - ref_bf))
    )
    assert jnp.allclose(out, ref_f32, atol=5e-2, rtol=5e-2), float(
        jnp.max(jnp.abs(out - ref_f32))
    )

    print("KERNEL_OK")
</pallas_src>

<mosaic_0001>
module attributes {stable_mosaic.version = 11 : i64} {
  func.func @_nchl_fused_kernel(%arg0: i32, %arg1: memref<8x128xf32, #tpu.memory_space<vmem>>, %arg2: memref<128x128xbf16, #tpu.memory_space<vmem>>, %arg3: memref<128x128xbf16, #tpu.memory_space<vmem>>, %arg4: memref<8x128xf32, #tpu.memory_space<vmem>>) attributes {dimension_semantics = [#tpu.dimension_semantics<parallel>], iteration_bounds = array<i64: 1>, scalar_prefetch = 0 : i64, scratch_operands = 0 : i64, tpu.core_type = #tpu.core_type<tc>, window_params = [{transform_indices = @transform_0, window_bounds = array<i64: 8, 128>}, {pipeline_mode = #tpu.pipeline_mode<synchronous>, transform_indices = @transform_1, window_bounds = array<i64: 128, 128>}, {pipeline_mode = #tpu.pipeline_mode<synchronous>, transform_indices = @transform_2, window_bounds = array<i64: 128, 128>}, {transform_indices = @transform_3, window_bounds = array<i64: 8, 128>}]} {
    %c0 = arith.constant 0 : index
    %c0_0 = arith.constant 0 : index
    %0 = vector.load %arg1[%c0, %c0_0] : memref<8x128xf32, #tpu.memory_space<vmem>>, vector<8x128xf32>
    %1 = arith.truncf %0 : vector<8x128xf32> to vector<8x128xbf16>
    %c0_1 = arith.constant 0 : index
    %c0_2 = arith.constant 0 : index
    %2 = vector.load %arg2[%c0_1, %c0_2] : memref<128x128xbf16, #tpu.memory_space<vmem>>, vector<128x128xbf16>
    %cst = arith.constant dense<0.000000e+00> : vector<8x128xf32>
    %3 = tpu.matmul %1, %2, %cst {dimension_numbers = #tpu.dot_dimension_numbers<[1], [0], [0], [1], [0, 0, 1, 1], [], []>} : vector<8x128xbf16>, vector<128x128xbf16>, vector<8x128xf32> -> vector<8x128xf32>
    %4 = math.tanh %3 : vector<8x128xf32>
    %5 = arith.truncf %4 : vector<8x128xf32> to vector<8x128xbf16>
    %c0_3 = arith.constant 0 : index
    %c0_4 = arith.constant 0 : index
    %6 = vector.load %arg3[%c0_3, %c0_4] : memref<128x128xbf16, #tpu.memory_space<vmem>>, vector<128x128xbf16>
    %cst_5 = arith.constant dense<0.000000e+00> : vector<8x128xf32>
    %7 = tpu.matmul %5, %6, %cst_5 {dimension_numbers = #tpu.dot_dimension_numbers<[1], [0], [0], [1], [0, 0, 1, 1], [], []>} : vector<8x128xbf16>, vector<128x128xbf16>, vector<8x128xf32> -> vector<8x128xf32>
    %8 = math.tanh %7 : vector<8x128xf32>
    %c0_6 = arith.constant 0 : index
    %c0_7 = arith.constant 0 : index
    %9 = vector.load %arg4[%c0_6, %c0_7] : memref<8x128xf32, #tpu.memory_space<vmem>>, vector<8x128xf32>
    tpu.vector_store %arg4[%c0_6, %c0_7], %8 {strides = array<i32>} : memref<8x128xf32, #tpu.memory_space<vmem>>, vector<8x128xf32>,
    return
  }
  func.func @transform_0(%arg0: i32) -> (i32, i32) {
    %c0_i32 = arith.constant 0 : i32
    %c0_i32_0 = arith.constant 0 : i32
    return %arg0, %c0_i32 : i32, i32
  }
  func.func @transform_1(%arg0: i32) -> (i32, i32) {
    %c0_i32 = arith.constant 0 : i32
    %c0_i32_0 = arith.constant 0 : i32
    %c0_i32_1 = arith.constant 0 : i32
    return %c0_i32, %c0_i32_0 : i32, i32
  }
  func.func @transform_2(%arg0: i32) -> (i32, i32) {
    %c0_i32 = arith.constant 0 : i32
    %c0_i32_0 = arith.constant 0 : i32
    %c0_i32_1 = arith.constant 0 : i32
    return %c0_i32, %c0_i32_0 : i32, i32
  }
  func.func @transform_3(%arg0: i32) -> (i32, i32) {
    %c0_i32 = arith.constant 0 : i32
    %c0_i32_0 = arith.constant 0 : i32
    return %arg0, %c0_i32 : i32, i32
  }
}

</mosaic_0001>

<bundles_post_ra>
// kernel: tpu_custom_call.1
= control target key start
LH: loop header
LB: loop body
LE: loop exit
PB: predicated region body
PF: predicated region fallthrough
CT: control target
= control target key end

     0   :  { %8 = vsyncpa [#allocation3], 0  ;;  %s513_s0 = inlined_call_operand.hbm [shape: f32[8,128], index: 0, kind: input, shape index: {}]   ;;  %s514_s1 = inlined_call_operand.hbm [shape: bf16[128,128], index: 1, kind: input, shape index: {}]   ;;  %s515_s2 = inlined_call_operand.hbm [shape: bf16[128,128], index: 2, kind: input, shape index: {}]   ;;  %s516_s3 = inlined_call_operand.hbm [shape: f32[8,128], index: 3, kind: output, shape index: {}]  }
   0x1   :  { %9 = vsyncpa [#allocation6], 0 }
   0x2   :  { %10 = vsyncpa [#allocation4], 0  ;;  %s473_s12 = smov [#allocation5]  }
   0x3   :  { %s26_s13 = sshll.u32 %s473_s12, 4  ;;  %s27_s13 = int_to_ptr.vmem [resolvable:$true] %s26_s13 }
   0x4   :  { %s395_s14 = scalar_lea.vmem %s27_s13, 1024  ;;  %p400_p1 = scmp.lt.s32.totalorder %s27_s13, %s27_s13 }
   0x5   :  { %p396_p0 = scmp.ne.s32.totalorder %s27_s13, %s395_s14  ;;  %p401_p2 = scmp.lt.s32.totalorder %s395_s14, %s395_s14 }
   0x7   :  { %p402_p3 = por %p401_p2, %p400_p1 }
   0x9   :  { %p403_p4 = pnand %p402_p3, %p396_p0 }
   0xb   :  { %406 = shalt.err (!%p403_p4)
}
   0xc   :  { %s474_s15 = smov 64   ;;  %s475_s16 = smov 4  }
   0xd   :  { %32 = dma.hbm_to_vmem [thread:$0]  %s514_s1, 1024, %s27_s13, [#allocation6], %s474_s15, %s474_s15, %s475_s16  }
   0xe   :  { %s476_s19 = smov [#allocation2]   ;;  %s477_s21 = smov [#allocation7]  }
   0xf   :  { %s17_s20 = sshll.u32 %s476_s19, 4  ;;  %s38_s22 = sshll.u32 %s477_s21, 4  ;;  %s18_s20 = int_to_ptr.vmem [resolvable:$true] %s17_s20  ;;  %s39_s22 = int_to_ptr.vmem [resolvable:$true] %s38_s22 }
  0x10   :  { %s415_s23 = scalar_lea.vmem %s18_s20, 128  ;;  %p420_p6 = scmp.lt.s32.totalorder %s18_s20, %s18_s20 }
  0x11   :  { %p416_p5 = scmp.ne.s32.totalorder %s18_s20, %s415_s23  ;;  %p421_p7 = scmp.lt.s32.totalorder %s415_s23, %s415_s23 }
  0x13   :  { %p422_p8 = por %p421_p7, %p420_p6 }
  0x15   :  { %p423_p9 = pnand %p422_p8, %p416_p5 }
  0x17   :  { %426 = shalt.err (!%p423_p9)
}
  0x18   :  { %20 = dma.hbm_to_vmem [thread:$0]  %s513_s0, 128, %s18_s20, [#allocation3]  }
  0x19   :  { %s435_s26 = scalar_lea.vmem %s39_s22, 1024  ;;  %p440_p11 = scmp.lt.s32.totalorder %s39_s22, %s39_s22 }
  0x1a   :  { %p436_p10 = scmp.ne.s32.totalorder %s39_s22, %s435_s26  ;;  %p441_p12 = scmp.lt.s32.totalorder %s435_s26, %s435_s26 }
  0x1c   :  { %p442_p13 = por %p441_p12, %p440_p11 }
  0x1e   :  { %p443_p0 = pnand %p442_p13, %p436_p10 }
  0x20   :  { %446 = shalt.err (!%p443_p0)
}
  0x21   :  { %44 = dma.hbm_to_vmem [thread:$0]  %s515_s2, 1024, %s39_s22, [#allocation6], %s474_s15, %s474_s15, %s475_s16  }
  0x22   :  { %467 = dma.done.wait [#allocation3], 128  }
  0x23   :  { %468 = vsyncadd [#allocation3], 4294967168 }
  0x24   :  { %469 = dma.done.wait [#allocation6], 2048  }
  0x25   :  { %470 = vsyncadd [#allocation6], 4294965248  ;;  %v478_v0 = vmov 0.0   ;;  %vm479_vm0 = vmmov 0   ;;  %v367_v1 = vld [vmem:[#allocation5 + $0x38] sm:$0xff]   ;;  %v368_v2 = vld [vmem:[#allocation5 + $0x30] sm:$0xff]  }
  0x26   :  { %319 = vmatprep.subr.bf16.mxu0 %v478_v0  ;;  %335 = vmatprep.mubr.msk.bf16.mxu0 %vm479_vm0, %v478_v0  ;;  %v369_v3 = vld [vmem:[#allocation5 + $0x28] sm:$0xff]   ;;  %v375_v4 = vld [vmem:[#allocation7 + $0x38] sm:$0xff]   ;;  %v370_v5 = vld [vmem:[#allocation5 + $0x20] sm:$0xff]   ;;  %s480_s0 = smov [#allocation8]  }
  0x27   :  { %339 = vmatprep.subr.bf16.mxu1 %v478_v0  ;;  %355 = vmatprep.mubr.msk.bf16.mxu1 %vm479_vm0, %v478_v0  ;;  %v376_v6 = vld [vmem:[#allocation7 + $0x30] sm:$0xff]   ;;  %v371_v7 = vld [vmem:[#allocation5 + $0x18] sm:$0xff]   ;;  %v377_v8 = vld [vmem:[#allocation7 + $0x28] sm:$0xff]   ;;  %s275_s2 = sshll.u32 %s480_s0, 4  ;;  %s276_s2 = int_to_ptr.vmem [resolvable:$true] %s275_s2 }
  0x28   :  { %320 = vmatpush3.bf16.msra.mxu0 %v367_v1  ;;  %340 = vmatpush3.bf16.msra.mxu1 %v375_v4  ;;  %v372_v9 = vld [vmem:[#allocation5 + $0x10] sm:$0xff]   ;;  %v378_v10 = vld [vmem:[#allocation7 + $0x20] sm:$0xff]   ;;  %v373_v11 = vld [vmem:[#allocation5 + $0x8] sm:$0xff]   ;;  %s447_s28 = scalar_lea.vmem %s276_s2, 128  ;;  %p452_p2 = scmp.lt.s32.totalorder %s276_s2, %s276_s2 }
  0x29   :  { %321 = vmatprep.subr.bf16.mxu0 %v478_v0  ;;  %341 = vmatprep.subr.bf16.mxu1 %v478_v0  ;;  %v374_v12 = vld [vmem:[#allocation5] sm:$0xff]   ;;  %v55_v13 = vld [vmem:[#allocation2] sm:$0xff]  ;;  %v380_v16 = vld [vmem:[#allocation7 + $0x10] sm:$0xff]   ;;  %p448_p1 = scmp.ne.s32.totalorder %s276_s2, %s447_s28  ;;  %p453_p3 = scmp.lt.s32.totalorder %s447_s28, %s447_s28 }
  0x2a   :  { %v56_v14 = vpack.c.bf16 %v55_v13, %v55_v13  ;;  %v379_v15 = vld [vmem:[#allocation7 + $0x18] sm:$0xff]   ;;  %v381_v17 = vld [vmem:[#allocation7 + $0x8] sm:$0xff]   ;;  %v382_v18 = vld [vmem:[#allocation7] sm:$0xff]  }
  0x2b   :  { %p454_p4 = por %p453_p3, %p452_p2 }
  0x2c   :  { %322 = vmatpush3.bf16.msra.mxu0 %v368_v2  ;;  %342 = vmatpush3.bf16.msra.mxu1 %v376_v6 }
  0x2d   :  { %323 = vmatprep.subr.bf16.mxu0 %v478_v0  ;;  %343 = vmatprep.subr.bf16.mxu1 %v478_v0  ;;  %p455_p5 = pnand %p454_p4, %p448_p1 }
  0x30   :  { %324 = vmatpush3.bf16.msra.mxu0 %v369_v3  ;;  %344 = vmatpush3.bf16.msra.mxu1 %v377_v8 }
  0x31   :  { %325 = vmatprep.subr.bf16.mxu0 %v478_v0  ;;  %345 = vmatprep.subr.bf16.mxu1 %v478_v0 }
  0x34   :  { %326 = vmatpush3.bf16.msra.mxu0 %v370_v5  ;;  %346 = vmatpush3.bf16.msra.mxu1 %v378_v10 }
  0x35   :  { %327 = vmatprep.subr.bf16.mxu0 %v478_v0  ;;  %347 = vmatprep.subr.bf16.mxu1 %v478_v0 }
  0x38   :  { %328 = vmatpush3.bf16.msra.mxu0 %v371_v7  ;;  %348 = vmatpush3.bf16.msra.mxu1 %v379_v15 }
  0x39   :  { %329 = vmatprep.subr.bf16.mxu0 %v478_v0  ;;  %349 = vmatprep.subr.bf16.mxu1 %v478_v0 }
  0x3c   :  { %330 = vmatpush3.bf16.msra.mxu0 %v372_v9  ;;  %350 = vmatpush3.bf16.msra.mxu1 %v380_v16 }
  0x3d   :  { %331 = vmatprep.subr.bf16.mxu0 %v478_v0  ;;  %351 = vmatprep.subr.bf16.mxu1 %v478_v0 }
  0x40   :  { %332 = vmatpush3.bf16.msra.mxu0 %v373_v11  ;;  %352 = vmatpush3.bf16.msra.mxu1 %v381_v17 }
  0x41   :  { %333 = vmatprep.subr.bf16.mxu0 %v478_v0  ;;  %353 = vmatprep.subr.bf16.mxu1 %v478_v0 }
  0x44   :  { %334 = vmatpush3.bf16.msra.mxu0 %v374_v12  ;;  %354 = vmatpush3.bf16.msra.mxu1 %v382_v18 }
  0x47   :  { %336 = vmatmul.mubr.bf16.vlgmr.msra.gmra.mxu0 %v56_v14 }
 0x107   :  { %v155_v19 = vpop.f32.mrf.mxu0 }
 0x108   :  { %383 = vtanh.f32 %v155_v19 }
 0x109   :  { %v337_v20 = vpop.f32.mrf.mxu0 }
 0x10b   :  { %v158_v21 = vpop.f32.mrf.mxu0 }
 0x10d   :  { %v338_v22 = vpop.f32.mrf.mxu0 }
 0x115   :  { %v384_v23 = vpop.eup %383 }
 0x116   :  { %v162_v24 = vpack.c.bf16 %v384_v23, %v384_v23 }
 0x118   :  { %356 = vmatmul.mubr.bf16.vlgmr.msra.gmra.mxu1 %v162_v24 }
 0x1d8   :  { %v261_v25 = vpop.f32.mrf.mxu1 }
 0x1d9   :  { %385 = vtanh.f32 %v261_v25 }
 0x1da   :  { %v357_v26 = vpop.f32.mrf.mxu1 }
 0x1dc   :  { %v264_v27 = vpop.f32.mrf.mxu1 }
 0x1de   :  { %v358_v28 = vpop.f32.mrf.mxu1 }
 0x1e6   :  { %v386_v29 = vpop.eup %385 }
 0x1e7   :  { %268 = vst [vmem:[#allocation8] sm:$0xff] %v386_v29 }
 0x1e8   :  { %458 = shalt.err (!%p455_p5)
}
 0x1e9   :  { %278 = dma.vmem_to_hbm [thread:$0]  %s276_s2, 128, %s516_s3, [#allocation4]  }
 0x1ea   :  { %471 = dma.done.wait [#allocation4], 128  }
 0x1eb   :  { %472 = vsyncadd [#allocation4], 4294967168 }
 0x1ec   :  { %282 = vsyncpa [#allocation3], 1 }
 0x1ed   :  { %283 = vsyncpa [#allocation6], 1 }
 0x1ee   :  { %284 = vsyncpa [#allocation4], 1 }

</bundles_post_ra>
